<compile_context>
chip_gen: v6e
topology: v6e:2x2x1
jax: 0.10.0
libtpu: 0.0.40
codegen_flags: <defaults>
</compile_context>

<pallas_src>
import functools
import math

import jax
import jax.numpy as jnp
from jax.experimental import pallas as pl
from jax.experimental.pallas import tpu as pltpu

PAD_ID = 0
LN_EPS = 1e-12          # BertConfig.layer_norm_eps default
MASK_NEG = -1e9         # additive attention bias applied to padded key positions


@functools.lru_cache(maxsize=None)
def _vmem_capacity_bytes():
    try:
        return int(pltpu.get_tpu_info().vmem_capacity_bytes)
    except Exception:
        return 64 * 1024 * 1024      # conservative (v7x-sized) fallback


@functools.lru_cache(maxsize=None)
def _vmem_limit_bytes():
    """Explicit scoped-VMEM limit: ~7/8 of physical, capped at 100 MiB."""
    return int(min(_vmem_capacity_bytes() * 7 // 8, 100 * 1024 * 1024))


@functools.lru_cache(maxsize=None)
def _single_buffer_supported():
    """One-time probe: does this jax/Mosaic build accept pipeline_mode=pl.Buffered(1)?

    Keeps the capability check narrow so a genuine OOM / lowering error in the
    real encoder kernel is never silently retried with a larger configuration.
    """
    try:
        def k(a_ref, o_ref):
            o_ref[...] = a_ref[...] * 2.0

        f = pl.pallas_call(
            k,
            out_shape=jax.ShapeDtypeStruct((2, 8, 128), jnp.float32),
            grid=(2,),
            in_specs=[pl.BlockSpec((8, 128), lambda i: (0, 0),
                                   pipeline_mode=pl.Buffered(1))],
            out_specs=pl.BlockSpec((None, 8, 128), lambda i: (i, 0, 0)),
        )
        jax.block_until_ready(f(jnp.ones((8, 128), jnp.float32)))
        return True
    except Exception:
        return False


def _layernorm(x, g, b):
    mu = jnp.mean(x, axis=-1, keepdims=True)
    var = jnp.mean(jnp.square(x - mu), axis=-1, keepdims=True)
    return (x - mu) * jax.lax.rsqrt(var + LN_EPS) * g + b


def _choose_q_tile(seq_len):
    """Query-tile size: full sequence when small, else a multiple of 8.

    On small-VMEM chips (v7x: 64 MiB) cap the tile at 128 for long sequences
    so the resident (heads, TQ, S) f32 score tensor stays small.
    """
    if seq_len <= 256:
        return seq_len
    cap = 128 if (_vmem_capacity_bytes() <= 64 * 1024 * 1024 and seq_len >= 512) else 256
    for t in (256, 128, 64, 32, 16, 8):
        if t <= cap and seq_len % t == 0:
            return t
    return seq_len


# -----------------------------------------------------------------------------
# Kernel 1: fused embedding add (word + pos + type) + LayerNorm, gridded over B
# -----------------------------------------------------------------------------
def _emb_add_layernorm_kernel(x_ref, pos_ref, type_ref, g_ref, b_ref, o_ref):
    x = x_ref[...] + pos_ref[...] + type_ref[...]
    o_ref[...] = _layernorm(x, g_ref[...], b_ref[...])


def emb_add_layernorm(word_emb, pos_emb, type_emb, g, b):
    B, S, H = word_emb.shape
    return pl.pallas_call(
        _emb_add_layernorm_kernel,
        out_shape=jax.ShapeDtypeStruct((B, S, H), jnp.float32),
        grid_spec=pltpu.PrefetchScalarGridSpec(
            num_scalar_prefetch=0,
            grid=(B,),
            in_specs=[pl.BlockSpec((None, S, H), lambda i: (i, 0, 0)),
                      pl.BlockSpec((S, H), lambda i: (0, 0)),
                      pl.BlockSpec((1, H), lambda i: (0, 0)),
                      pl.BlockSpec((1, H), lambda i: (0, 0)),
                      pl.BlockSpec((1, H), lambda i: (0, 0))],
            out_specs=pl.BlockSpec((None, S, H), lambda i: (i, 0, 0)),
        ),
        compiler_params=pltpu.CompilerParams(
            dimension_semantics=("parallel",),
            vmem_limit_bytes=_vmem_limit_bytes(),
        ),
    )(word_emb, pos_emb, type_emb, g, b)


# -----------------------------------------------------------------------------
# Kernel 2: one BERT encoder layer, grid=(B, S // q_tile)
# -----------------------------------------------------------------------------
_LAYER_WEIGHT_NAMES = ('wqkv', 'bqkv', 'wo', 'bo', 'ln1_g', 'ln1_b',
                       'wi', 'bi', 'wf', 'bf', 'ln2_g', 'ln2_b')
# Indices (into the tuple above) of the big matmul weights that get Buffered(1).
_BIG_WEIGHT_IDX = frozenset({0, 2, 6, 8})   # wqkv, wo, wi, wf


def _encoder_layer_kernel(x_ref, mask_ref,
                          wqkv_ref, bqkv_ref, wo_ref, bo_ref,
                          ln1g_ref, ln1b_ref, wi_ref, bi_ref,
                          wf_ref, bf_ref, ln2g_ref, ln2b_ref,
                          out_ref,
                          q_s, kt_s, v_s,
                          *, num_heads, q_tile):
    S, H = x_ref.shape                      # batch dim squeezed by BlockSpec
    dh = H // num_heads
    qi = pl.program_id(1)

    # ---- fused QKV projection (Q pre-scaled by 1/sqrt(dh) in the weights),
    # ---- computed once per batch row (qi == 0) and cached in VMEM scratch.
    @pl.when(qi == 0)
    def _project():
        xb = x_ref[...].astype(jnp.bfloat16)                          # (S, H)
        qkv = jnp.dot(xb, wqkv_ref[...],
                      preferred_element_type=jnp.float32) + bqkv_ref[...]

        # TODO(synk): pre-reshape wqkv host-side to land head-major directly
        # and drop one of these relayouts.
        def to_heads(t):                                              # (S, H) -> (nh, S, dh)
            return jnp.swapaxes(t.reshape(S, num_heads, dh), 0, 1)

        q_s[...] = to_heads(qkv[:, 0 * H:1 * H]).astype(jnp.bfloat16)           # (nh, S, dh)
        # K is stored transposed (nh, dh, S): lane-dense in S, no per-step transpose.
        kt_s[...] = jnp.swapaxes(to_heads(qkv[:, 1 * H:2 * H]), 1, 2).astype(jnp.bfloat16)
        v_s[...] = to_heads(qkv[:, 2 * H:3 * H]).astype(jnp.bfloat16)           # (nh, S, dh)

    # ---- attention for this query tile (all heads batched) ----
    q_start = pl.multiple_of(qi * q_tile, q_tile)
    qh = q_s[:, pl.ds(q_start, q_tile), :]                            # (nh, TQ, dh) bf16

    s = jnp.einsum('nqd,ndk->nqk', qh, kt_s[...],
                   preferred_element_type=jnp.float32)                # (nh, TQ, S)
    s = s + mask_ref[...]                                             # (1, S) key bias
    s = s - jnp.max(s, axis=-1, keepdims=True)
    # TODO(synk): on v6e/v7x the exp could run in bf16 (EUP) for ~2x transcendental
    # throughput; kept f32 here to stay correct/portable on v5e.
    p = jnp.exp(s)
    p = p * pl.reciprocal(jnp.sum(p, axis=-1, keepdims=True), approx=True)

    ctx = jnp.einsum('nqk,nkd->nqd', p.astype(jnp.bfloat16), v_s[...],
                     preferred_element_type=jnp.float32)              # (nh, TQ, dh)

    # Output projection without relayout of ctx: batched per-head matmul against
    # wo stored head-major (nh, dh, H), then a cheap VALU sum over heads.
    partial = jnp.einsum('nqd,ndh->nqh', ctx.astype(jnp.bfloat16), wo_ref[...],
                         preferred_element_type=jnp.float32)          # (nh, TQ, H)
    attn_out = jnp.sum(partial, axis=0) + bo_ref[...]                 # (TQ, H)

    xq = x_ref[pl.ds(q_start, q_tile), :]                             # residual rows, f32
    h1 = _layernorm(attn_out + xq, ln1g_ref[...], ln1b_ref[...])

    # TODO(synk): HF BERT default "gelu" is the exact erf GELU; tanh approx is
    # used for robust Mosaic lowering (max abs err ~1e-3).
    inter = jax.nn.gelu(jnp.dot(h1.astype(jnp.bfloat16), wi_ref[...],
                                preferred_element_type=jnp.float32) + bi_ref[...],
                        approximate=True)
    ffn_out = jnp.dot(inter.astype(jnp.bfloat16), wf_ref[...],
                      preferred_element_type=jnp.float32) + bf_ref[...]
    out_ref[...] = _layernorm(ffn_out + h1, ln2g_ref[...], ln2b_ref[...])


def _const_index_map(ndim):
    def imap(b, qi):
        return (0,) * ndim
    return imap


@functools.lru_cache(maxsize=None)
def _build_encoder_call(B, S, H, num_heads, q_tile, single_buffer, weight_shapes):
    dh = H // num_heads

    w_specs = []
    for idx, shp in enumerate(weight_shapes):
        imap = _const_index_map(len(shp))
        if single_buffer and idx in _BIG_WEIGHT_IDX:
            # Grid-invariant big matmul weights: single buffering halves their VMEM.
            w_specs.append(pl.BlockSpec(shp, imap, pipeline_mode=pl.Buffered(1)))
        else:
            w_specs.append(pl.BlockSpec(shp, imap))

    grid_spec = pltpu.PrefetchScalarGridSpec(
        num_scalar_prefetch=0,
        grid=(B, S // q_tile),
        in_specs=[pl.BlockSpec((None, S, H), lambda b, qi: (b, 0, 0)),
                  pl.BlockSpec((None, 1, S), lambda b, qi: (b, 0, 0))] + w_specs,
        out_specs=pl.BlockSpec((None, q_tile, H), lambda b, qi: (b, qi, 0)),
        scratch_shapes=[pltpu.VMEM((num_heads, S, dh), jnp.bfloat16),   # Q
                        pltpu.VMEM((num_heads, dh, S), jnp.bfloat16),   # K^T (lane-dense S)
                        pltpu.VMEM((num_heads, S, dh), jnp.bfloat16)],  # V
    )
    kernel = functools.partial(_encoder_layer_kernel,
                               num_heads=num_heads, q_tile=q_tile)
    return pl.pallas_call(
        kernel,
        out_shape=jax.ShapeDtypeStruct((B, S, H), jnp.float32),
        grid_spec=grid_spec,
        compiler_params=pltpu.CompilerParams(
            # qi axis reuses the scratch Q/K/V cache -> must stay sequential.
            dimension_semantics=("parallel", "arbitrary"),
            vmem_limit_bytes=_vmem_limit_bytes(),
        ),
    )


def encoder_layer(h, mask_bias, lp, *, num_heads):
    B, S, H = h.shape
    q_tile = _choose_q_tile(S)
    weights = tuple(lp[n] for n in _LAYER_WEIGHT_NAMES)
    shapes = tuple(tuple(int(d) for d in w.shape) for w in weights)
    call = _build_encoder_call(B, S, H, num_heads, q_tile,
                               _single_buffer_supported(), shapes)
    return call(h, mask_bias, *weights)


# -----------------------------------------------------------------------------
# Kernel 3a: mean pool over sequence (gridded over batch)
# Kernel 3b: classifier head, single (B, H) @ (H, C) matmul
# -----------------------------------------------------------------------------
def _mean_pool_kernel(h_ref, o_ref):
    o_ref[...] = jnp.mean(h_ref[...], axis=0, keepdims=True)           # (1, H)


def mean_pool(h):
    B, S, H = h.shape
    out = pl.pallas_call(
        _mean_pool_kernel,
        out_shape=jax.ShapeDtypeStruct((B, 1, H), jnp.float32),
        grid_spec=pltpu.PrefetchScalarGridSpec(
            num_scalar_prefetch=0,
            grid=(B,),
            in_specs=[pl.BlockSpec((None, S, H), lambda i: (i, 0, 0))],
            out_specs=pl.BlockSpec((None, 1, H), lambda i: (i, 0, 0)),
        ),
        compiler_params=pltpu.CompilerParams(
            dimension_semantics=("parallel",),
            vmem_limit_bytes=_vmem_limit_bytes(),
        ),
    )(h)
    return out.reshape(B, H)


def _classifier_kernel(p_ref, w_ref, b_ref, o_ref):
    o_ref[...] = jnp.dot(p_ref[...].astype(jnp.bfloat16), w_ref[...],
                         preferred_element_type=jnp.float32) + b_ref[...]


def classifier(pooled, w, b):
    B, H = pooled.shape
    C = w.shape[1]
    # Single block, no grid: one (B, H) @ (H, C) MXU call instead of B M=1 calls.
    return pl.pallas_call(
        _classifier_kernel,
        out_shape=jax.ShapeDtypeStruct((B, C), jnp.float32),
    )(pooled, w, b)


# -----------------------------------------------------------------------------
# Parameter init (deterministic, synthetic) + forward glue
# -----------------------------------------------------------------------------
def init_params(key, vocab_size, hidden, n_layers, n_heads, d_ff, num_classes,
                max_pos=32, type_vocab=2):
    keys = jax.random.split(key, 4 + n_layers)
    dh = hidden // n_heads
    scale = 1.0 / math.sqrt(dh)

    def w(k, shape, dtype=jnp.float32):
        return (0.02 * jax.random.normal(k, shape)).astype(dtype)

    params = {
        'num_heads': n_heads,
        'word_emb': w(keys[0], (vocab_size, hidden)),
        'pos_emb': w(keys[1], (max_pos, hidden)),
        'type_emb': w(keys[2], (type_vocab, hidden)),
        'emb_ln_g': jnp.ones((1, hidden), jnp.float32),
        'emb_ln_b': jnp.zeros((1, hidden), jnp.float32),
        'out_w': w(keys[3], (hidden, num_classes), jnp.bfloat16),
        'out_b': jnp.zeros((1, num_classes), jnp.float32),
        'layers': [],
    }
    for li in range(n_layers):
        lk = jax.random.split(keys[4 + li], 6)
        # Fused Q|K|V projection [H, 3H]; the 1/sqrt(dh) attention scale is folded
        # into the Q columns (and Q bias, here zero), so the kernel never scales
        # the (heads, TQ, S) score tensor.
        wq = w(lk[0], (hidden, hidden)) * scale
        wk = w(lk[1], (hidden, hidden))
        wv = w(lk[2], (hidden, hidden))
        params['layers'].append({
            'wqkv': jnp.concatenate([wq, wk, wv], axis=1).astype(jnp.bfloat16),
            'bqkv': jnp.zeros((1, 3 * hidden), jnp.float32),
            # Attention output projection stored head-major (nh, dh, H) so the
            # kernel contracts ctx against it without a ctx relayout.
            'wo': w(lk[3], (hidden, hidden)).reshape(n_heads, dh, hidden).astype(jnp.bfloat16),
            'bo': jnp.zeros((1, hidden), jnp.float32),
            'ln1_g': jnp.ones((1, hidden), jnp.float32),
            'ln1_b': jnp.zeros((1, hidden), jnp.float32),
            'wi': w(lk[4], (hidden, d_ff), jnp.bfloat16),
            'bi': jnp.zeros((1, d_ff), jnp.float32),
            'wf': w(lk[5], (d_ff, hidden), jnp.bfloat16),
            'bf': jnp.zeros((1, hidden), jnp.float32),
            'ln2_g': jnp.ones((1, hidden), jnp.float32),
            'ln2_b': jnp.zeros((1, hidden), jnp.float32),
        })
    return params


def bert_classifier_forward(params, input_ids):
    B, S = input_ids.shape
    # attn = (x != 0).float()  -> converted to an additive bias on attention scores
    attn = (input_ids != PAD_ID).astype(jnp.float32)             # (B, S)
    mask_bias = ((1.0 - attn) * MASK_NEG).reshape(B, 1, S)

    # Word-embedding gather stays in XLA (data-dependent gather); pos/type adds
    # and LayerNorm are fused into one Pallas pass (saves an HBM round trip).
    word = jnp.take(params['word_emb'], input_ids, axis=0).astype(jnp.float32)
    h = emb_add_layernorm(word, params['pos_emb'][:S], params['type_emb'][0:1],
                          params['emb_ln_g'], params['emb_ln_b'])

    for lp in params['layers']:
        h = encoder_layer(h, mask_bias, lp, num_heads=params['num_heads'])

    # last_hidden_state.mean(dim=1) -> Dropout (identity in eval) -> Linear
    pooled = mean_pool(h)
    return classifier(pooled, params['out_w'], params['out_b'])


if __name__ == "__main__":
    # small config consistent with the module: vocab=100, h_size=32, n_layers=2,
    # n_heads=4, d_ff=64, num_classes=3; batch=2, seq=8
    B, S = 2, 8
    vocab, hidden, n_layers, n_heads, d_ff, n_classes = 100, 32, 2, 4, 64, 3

    key = jax.random.PRNGKey(0)
    pkey, ikey = jax.random.split(key)
    params = init_params(pkey, vocab, hidden, n_layers, n_heads, d_ff, n_classes,
                         max_pos=S)

    input_ids = jax.random.randint(ikey, (B, S), 1, vocab, dtype=jnp.int32)
    input_ids = input_ids.at[0, -1].set(PAD_ID)   # exercise the attention-mask path

    logits = bert_classifier_forward(params, input_ids)
    jax.block_until_ready(logits)
    assert logits.shape == (B, n_classes) and logits.dtype == jnp.float32
    print("KERNEL_OK")
</pallas_src>

<mosaic_0001>
module attributes {stable_mosaic.version = 11 : i64} {
  func.func @_emb_add_layernorm_kernel(%arg0: i32, %arg1: memref<1x8x32xf32, #tpu.memory_space<vmem>>, %arg2: memref<8x32xf32, #tpu.memory_space<vmem>>, %arg3: memref<1x32xf32, #tpu.memory_space<vmem>>, %arg4: memref<1x32xf32, #tpu.memory_space<vmem>>, %arg5: memref<1x32xf32, #tpu.memory_space<vmem>>, %arg6: memref<1x8x32xf32, #tpu.memory_space<vmem>>) attributes {dimension_semantics = [#tpu.dimension_semantics<parallel>], iteration_bounds = array<i64: 2>, scalar_prefetch = 0 : i64, scratch_operands = 0 : i64, tpu.core_type = #tpu.core_type<tc>, window_params = [{transform_indices = @transform_0, window_bounds = array<i64: 1, 8, 32>}, {pipeline_mode = #tpu.pipeline_mode<synchronous>, transform_indices = @transform_1, window_bounds = array<i64: 8, 32>}, {pipeline_mode = #tpu.pipeline_mode<synchronous>, transform_indices = @transform_2, window_bounds = array<i64: 1, 32>}, {pipeline_mode = #tpu.pipeline_mode<synchronous>, transform_indices = @transform_3, window_bounds = array<i64: 1, 32>}, {pipeline_mode = #tpu.pipeline_mode<synchronous>, transform_indices = @transform_4, window_bounds = array<i64: 1, 32>}, {transform_indices = @transform_5, window_bounds = array<i64: 1, 8, 32>}]} {
    %c0 = arith.constant 0 : index
    %c0_0 = arith.constant 0 : index
    %c0_1 = arith.constant 0 : index
    %0 = vector.load %arg1[%c0, %c0_0, %c0_1] : memref<1x8x32xf32, #tpu.memory_space<vmem>>, vector<1x8x32xf32>
    %1 = vector.shape_cast %0 : vector<1x8x32xf32> to vector<8x32xf32>
    %c0_2 = arith.constant 0 : index
    %c0_3 = arith.constant 0 : index
    %2 = vector.load %arg2[%c0_2, %c0_3] : memref<8x32xf32, #tpu.memory_space<vmem>>, vector<8x32xf32>
    %3 = arith.addf %1, %2 : vector<8x32xf32>
    %c0_4 = arith.constant 0 : index
    %c0_5 = arith.constant 0 : index
    %4 = vector.load %arg3[%c0_4, %c0_5] : memref<1x32xf32, #tpu.memory_space<vmem>>, vector<1x32xf32>
    %5 = vector.broadcast %4 : vector<1x32xf32> to vector<8x32xf32>
    %6 = arith.addf %3, %5 : vector<8x32xf32>
    %c0_6 = arith.constant 0 : index
    %c0_7 = arith.constant 0 : index
    %7 = vector.load %arg4[%c0_6, %c0_7] : memref<1x32xf32, #tpu.memory_space<vmem>>, vector<1x32xf32>
    %c0_8 = arith.constant 0 : index
    %c0_9 = arith.constant 0 : index
    %8 = vector.load %arg5[%c0_8, %c0_9] : memref<1x32xf32, #tpu.memory_space<vmem>>, vector<1x32xf32>
    %cst = arith.constant dense<0.000000e+00> : vector<8xf32>
    %9 = vector.multi_reduction <add>, %6, %cst [1] : vector<8x32xf32> to vector<8xf32>
    %10 = vector.shape_cast %9 : vector<8xf32> to vector<8x1xf32>
    %cst_10 = arith.constant 3.200000e+01 : f32
    %11 = vector.broadcast %cst_10 : f32 to vector<8x1xf32>
    %12 = arith.divf %10, %11 : vector<8x1xf32>
    %13 = vector.broadcast %12 : vector<8x1xf32> to vector<8x32xf32>
    %14 = arith.subf %6, %13 : vector<8x32xf32>
    %15 = arith.mulf %14, %14 : vector<8x32xf32>
    %cst_11 = arith.constant dense<0.000000e+00> : vector<8xf32>
    %16 = vector.multi_reduction <add>, %15, %cst_11 [1] : vector<8x32xf32> to vector<8xf32>
    %17 = vector.shape_cast %16 : vector<8xf32> to vector<8x1xf32>
    %cst_12 = arith.constant 3.200000e+01 : f32
    %18 = vector.broadcast %cst_12 : f32 to vector<8x1xf32>
    %19 = arith.divf %17, %18 : vector<8x1xf32>
    %20 = vector.broadcast %12 : vector<8x1xf32> to vector<8x32xf32>
    %21 = arith.subf %6, %20 : vector<8x32xf32>
    %cst_13 = arith.constant 9.99999996E-13 : f32
    %22 = vector.broadcast %cst_13 : f32 to vector<8x1xf32>
    %23 = arith.addf %19, %22 : vector<8x1xf32>
    %24 = math.rsqrt %23 : vector<8x1xf32>
    %25 = vector.broadcast %24 : vector<8x1xf32> to vector<8x32xf32>
    %26 = arith.mulf %21, %25 : vector<8x32xf32>
    %27 = vector.broadcast %7 : vector<1x32xf32> to vector<8x32xf32>
    %28 = arith.mulf %26, %27 : vector<8x32xf32>
    %29 = vector.broadcast %8 : vector<1x32xf32> to vector<8x32xf32>
    %30 = arith.addf %28, %29 : vector<8x32xf32>
    %c0_14 = arith.constant 0 : index
    %c0_15 = arith.constant 0 : index
    %c0_16 = arith.constant 0 : index
    %31 = vector.load %arg6[%c0_14, %c0_15, %c0_16] : memref<1x8x32xf32, #tpu.memory_space<vmem>>, vector<1x8x32xf32>
    %32 = vector.shape_cast %31 : vector<1x8x32xf32> to vector<8x32xf32>
    %33 = vector.shape_cast %30 : vector<8x32xf32> to vector<1x8x32xf32>
    tpu.vector_store %arg6[%c0_14, %c0_15, %c0_16], %33 {strides = array<i32>} : memref<1x8x32xf32, #tpu.memory_space<vmem>>, vector<1x8x32xf32>,
    return
  }
  func.func @transform_0(%arg0: i32) -> (i32, i32, i32) {
    %c0_i32 = arith.constant 0 : i32
    %c0_i32_0 = arith.constant 0 : i32
    %c0_i32_1 = arith.constant 0 : i32
    return %arg0, %c0_i32, %c0_i32_0 : i32, i32, i32
  }
  func.func @transform_1(%arg0: i32) -> (i32, i32) {
    %c0_i32 = arith.constant 0 : i32
    %c0_i32_0 = arith.constant 0 : i32
    %c0_i32_1 = arith.constant 0 : i32
    return %c0_i32, %c0_i32_0 : i32, i32
  }
  func.func @transform_2(%arg0: i32) -> (i32, i32) {
    %c0_i32 = arith.constant 0 : i32
    %c0_i32_0 = arith.constant 0 : i32
    %c0_i32_1 = arith.constant 0 : i32
    return %c0_i32, %c0_i32_0 : i32, i32
  }
  func.func @transform_3(%arg0: i32) -> (i32, i32) {
    %c0_i32 = arith.constant 0 : i32
    %c0_i32_0 = arith.constant 0 : i32
    %c0_i32_1 = arith.constant 0 : i32
    return %c0_i32, %c0_i32_0 : i32, i32
  }
  func.func @transform_4(%arg0: i32) -> (i32, i32) {
    %c0_i32 = arith.constant 0 : i32
    %c0_i32_0 = arith.constant 0 : i32
    %c0_i32_1 = arith.constant 0 : i32
    return %c0_i32, %c0_i32_0 : i32, i32
  }
  func.func @transform_5(%arg0: i32) -> (i32, i32, i32) {
    %c0_i32 = arith.constant 0 : i32
    %c0_i32_0 = arith.constant 0 : i32
    %c0_i32_1 = arith.constant 0 : i32
    return %arg0, %c0_i32, %c0_i32_0 : i32, i32, i32
  }
}

</mosaic_0001>

<bundles_post_ra>
// kernel: tpu_custom_call.1
= control target key start
LH: loop header
LB: loop body
LE: loop exit
PB: predicated region body
PF: predicated region fallthrough
CT: control target
= control target key end

     0   :  { %10 = vsyncpa [#allocation3], 0  ;;  %s805_s0 = inlined_call_operand.hbm [shape: f32[2,8,32], index: 0, kind: input, shape index: {}]   ;;  %s806_s1 = inlined_call_operand.hbm [shape: f32[8,32], index: 1, kind: input, shape index: {}]   ;;  %s807_s2 = inlined_call_operand.vmem [shape: f32[1,32], index: 2, kind: input, shape index: {}]   ;;  %s808_s3 = inlined_call_operand.vmem [shape: f32[1,32], index: 3, kind: input, shape index: {}]   ;;  %s809_s4 = inlined_call_operand.vmem [shape: f32[1,32], index: 4, kind: input, shape index: {}]   ;;  %s810_s5 = inlined_call_operand.hbm [shape: f32[2,8,32], index: 5, kind: output, shape index: {}]  }
   0x1   :  { %12 = vsyncpa [#allocation3 + $0x1], 0 }
   0x2   :  { %13 = vsyncpa [#allocation6], 0 }
   0x3   :  { %14 = vsyncpa [#allocation4], 0 }
   0x4   :  { %16 = vsyncpa [#allocation4 + $0x1], 0  ;;  %s623_s18 = smov 0   ;;  %s625_s19 = smov 0  }
   0x5   :  { %s627_s20 = smov 0   ;;  %s629_s21 = smov 0  }
   0x6 LB: > { %s644_s22 = sadd.s32 4294967295, %s588_s21   ;;  %s390_s23 = sadd.s32 4294967294, %s588_s21   ;;  %s588_s21 = sphi %s629_s21, %s833_s21   ;;  %s584_s20 = sphi %s627_s20, %s832_s20   ;;  %s580_s19 = sphi %s625_s19, %s831_s19   ;;  %s576_s18 = sphi %s623_s18, %s830_s18  }
   0x7   : > { %p42_p0 = scmp.ne.s32.totalorder %s580_s19, %s576_s18  ;;  %p811_p1 = scmp.eq.s32.totalorder %s644_s22, 0 }
   0x8   : > { %p156_p3 = scmp.eq.s32.totalorder %s390_s23, 1  ;;  %p391_p5 = scmp.ge.s32.totalorder %s588_s21, 1 }
   0x9   : > { %p653_p4 = por %p811_p1, %p42_p0  ;;  %p163_p7 = scmp.lt.s32.totalorder %s588_s21, 3 }
   0xa   : > { %p658_p6 = por %p156_p3, %p42_p0  ;;  %s590_s27 = smov [#allocation5]  }
   0xb   : > { %s815_s24 = scalar_select %p653_p4, 1, 0 }
   0xc   : > { %s816_s25 = scalar_select %p658_p6, 1, 0 }
   0xd   : > { %p663_p8 = pnand %p391_p5, %p163_p7  ;;  %s176_s28 = sshll.u32 %s590_s27, 4  ;;  %s177_s28 = int_to_ptr.vmem [resolvable:$true] %s176_s28 }
   0xe   : > { %s671_s29 = sadd.s32 1, %s588_s21   ;;  %s29_s8 = sadd.s32 1, %s584_s20 }
   0xf   : > { %s817_s26 = scalar_select %p663_p8, 1, 0 }
  0x10   : > { %p415_p10 = pneg %p663_p8  ;;  %s26_s6 = ssub.s32 %s588_s21, %s671_s29 }
  0x11   : > { %p681_p12 = scmp.eq.s32.totalorder %s26_s6, 0  ;;  %p36_p13 = scmp.ne.s32.totalorder %s584_s20, %s580_s19 }
  0x12   : > { %p675_p11 = pnand %p415_p10, %p811_p1  ;;  %s477_s9 = scalar_lea.vmem %s177_s28, 128 }
  0x13   : > { %p478_p3 = scmp.ne.s32.totalorder %s177_s28, %s477_s9  ;;  %p485_p9 = scmp.lt.s32.totalorder %s177_s28, %s177_s28 }
  0x14   : > { %p468_p0 = pneg %p675_p11  ;;  %p486_p2 = scmp.lt.s32.totalorder %s477_s9, %s477_s9 }
  0x16   : > { %p480_p5 = pnand %p478_p3, %p468_p0  ;;  %p487_p10 = por %p486_p2, %p485_p9 }
  0x18   : > { %p481_p7 = pneg %p480_p5 }
  0x1a   : > { %p488_p1 = pnand %p487_p10, %p481_p7 }
  0x1c   : > { %491 = shalt.err (!%p488_p1)
}
  0x1d   : > { %418 = dma.hbm_to_vmem [thread:$0]  (!%p675_p11), %s806_s1, 128, %s177_s28, [#allocation6]  }
  0x1e   : > { %s698_s12 = scalar_select %p681_p12, %s584_s20, %s29_s8  }
  0x1f   : > { %p37_p1 = scmp.eq.s32.totalorder %s588_s21, 0  ;;  %p820_p2 = scmp.eq.s32.totalorder %s644_s22, 1 }
  0x20   : > { %p428_p0 = scmp.lt.s32.totalorder %s588_s21, 2  ;;  %s196_s14 = sand.u32 1, %s584_s20  }
  0x21   : > { %p706_p9 = por %p820_p2, %p36_p13  ;;  %p38_p3 = por %p37_p1, %p36_p13 }
  0x22   : > { %s394_s15 = sshll.u32 %s196_s14, 3  ;;  %s395_s16 = sshll.u32 %s588_s21, 7 }
  0x23   : > { %s821_s13 = scalar_select %p706_p9, 1, 0 }
  0x24   : > { %s719_s27 = scalar_lea.hbm %s805_s0, %s395_s16  ;;  %s200_s28 = scalar_lea.vmem [#allocation2], %s394_s15 }
  0x25   : > { %s207_s30 = sshll.u32 %s200_s28, 4  ;;  %p721_p11 = pnand %p428_p0, %p38_p3  ;;  %s208_s30 = int_to_ptr.vmem [resolvable:$true] %s207_s30 }
  0x26   : > { %s197_s7 = scalar_lea.sflag [#allocation3], %s196_s14  ;;  %s492_s8 = scalar_lea.hbm %s719_s27, 128 }
  0x27   : > { %p493_p12 = scmp.ne.s32.totalorder %s719_s27, %s492_s8  ;;  %p494_p13 = pneg %p721_p11 }
  0x28   : > { %s497_s11 = scalar_lea.hbm %s805_s0, 256  ;;  %p498_p10 = scmp.lt.s32.totalorder %s719_s27, %s805_s0 }
  0x29   : > { %p495_p5 = pnand %p494_p13, %p493_p12  ;;  %p499_p1 = scmp.lt.s32.totalorder %s497_s11, %s492_s8 }
  0x2b   : > { %p496_p7 = pneg %p495_p5  ;;  %p500_p2 = por %p499_p1, %p498_p10 }
  0x2d   : > { %p501_p0 = pnand %p500_p2, %p496_p7 }
  0x2f   : > { %504 = shalt.err (!%p501_p0)
}
  0x30   : > { %s505_s17 = scalar_lea.vmem %s208_s30, 128  ;;  %s591_s14 = smov [#allocation2]  }
  0x31   : > { %p506_p3 = scmp.ne.s32.totalorder %s208_s30, %s505_s17  ;;  %s510_s23 = sshll.u32 %s591_s14, 4  ;;  %s511_s23 = int_to_ptr.vmem [resolvable:$false] %s510_s23 }
  0x32   : > { %s512_s28 = scalar_lea.vmem %s511_s23, 256  ;;  %p513_p12 = scmp.lt.s32.totalorder %s208_s30, %s511_s23 }
  0x33   : > { %p508_p6 = pnand %p506_p3, %p494_p13  ;;  %p514_p5 = scmp.lt.s32.totalorder %s512_s28, %s505_s17 }
  0x35   : > { %p509_p9 = pneg %p508_p6  ;;  %p515_p4 = por %p514_p5, %p513_p12 }
  0x37   : > { %p516_p8 = pnand %p515_p4, %p509_p9 }
  0x39   : > { %519 = shalt.err (!%p516_p8)
}
  0x3a   : > { %422 = dma.hbm_to_vmem [thread:$0]  (!%p721_p11), %s719_s27, 128, %s208_s30, %s197_s7  }
  0x3b   : > { %p823_p7 = scmp.ne.s32.totalorder %s817_s26, 0 }
  0x3c   : > { %s742_s8 = sand.u32 (!%p823_p7), 1, %s580_s19   ;;  %p824_p4 = scmp.ne.s32.totalorder (!%p823_p7), %s815_s24, 0 }
  0x3d   : > { %216 = sbr.rel (%p823_p7) target bundleno = 396 (0x18c), region = 40  ;;  %s397_s9 = sshll.u32 (!%p823_p7), %s742_s8, 3 }
  0x3e   : > { %s219_s10 = scalar_lea.sflag (!%p823_p7), [#allocation3], %s742_s8  ;;  %s222_s11 = scalar_lea.vmem (!%p823_p7), [#allocation2], %s397_s9 }
  0x42   : > { %563 = dma.done.wait (%p824_p4), %s219_s10, 128  }
  0x43   : > { %565 = vsyncadd (%p824_p4), %s219_s10, 4294967168  ;;  %p825_p6 = scmp.eq.s32.totalorder %s644_s22, 0 }
  0x45   : > { %567 = dma.done.wait (%p825_p6), [#allocation6], 128   ;;  %p826_p8 = pmov %p825_p6 }
  0x46   : > { %v253_v0 = vld [vmem:[%s222_s11] sm:$0xff]  ;;  %v254_v1 = vld [vmem:[#allocation5] sm:$0xff]  ;;  %vm266_vm0 = vcmask 261120   ;;  %s404_s16 = sshll.u32 %s644_s22, 7  ;;  %s252_s15 = scalar_lea.vmem [#allocation7], %s397_s9 }
  0x47   : > { %569 = vsyncadd (%p826_p8), [#allocation6], 4294967168  ;;  %v400_v2 = vld [vmem:[%s807_s2] ss:$0 sm:$0xff]  ;;  %v255_v3 = vadd.f32 %v254_v1, %v253_v0  ;;  %s310_s17 = sshll.u32 %s252_s15, 4  ;;  %s308_s28 = scalar_lea.hbm %s810_s5, %s404_s16  ;;  %s311_s17 = int_to_ptr.vmem [resolvable:$true] %s310_s17 }
  0x48   : > { %v401_v15 = vld [vmem:[%s808_s3] ss:$0 sm:$0xff]  ;;  %s297_s10 = scalar_lea.sflag [#allocation4], %s742_s8  ;;  %s520_s11 = scalar_lea.vmem %s311_s17, 128 }
  0x49   : > { %v263_v4 = vadd.f32 %v400_v2, %v255_v3  ;;  %v402_v17 = vld [vmem:[%s809_s4] ss:$0 sm:$0xff]  ;;  %p521_p9 = scmp.ne.s32.totalorder %s311_s17, %s520_s11  ;;  %p827_p11 = scmp.ne.s32.totalorder %s821_s13, 0 }
  0x4a   : > { %s592_s26 = smov [#allocation7]  }
  0x4b   : > { %v267_v5 = vsel %vm266_vm0, %v263_v4, 0.0  ;;  %p522_p13 = pnand %p521_p9, %p827_p11  ;;  %s524_s22 = sshll.u32 %s592_s26, 4  ;;  %s525_s22 = int_to_ptr.vmem [resolvable:$false] %s524_s22 }
  0x4c   : > { %268 = vadd.xlane.f32.xlu0 %v267_v5  ;;  %s526_s9 = scalar_lea.vmem %s525_s22, 256  ;;  %p527_p1 = scmp.lt.s32.totalorder %s311_s17, %s525_s22 }
  0x4d   : > { %p523_p10 = pneg %p522_p13  ;;  %p528_p2 = scmp.lt.s32.totalorder %s526_s9, %s520_s11 }
  0x4f   : > { %p529_p0 = por %p528_p2, %p527_p1 }
  0x51   : > { %p530_p3 = pnand %p529_p0, %p523_p10 }
  0xd5   : > { %v269_v6 = vpop.xlane.xlu0 %268 }
  0xd6   : > { %v271_v7 = vmul.f32 0.03125, %v269_v6 }
  0xd8   : > { %v272_v8 = vsub.f32 %v263_v4, %v271_v7 }
  0xda   : > { %v273_v9 = vmul.f32 %v272_v8, %v272_v8 }
  0xdc   : > { %v274_v10 = vsel %vm266_vm0, %v273_v9, 0.0 }
  0xdd   : > { %275 = vadd.xlane.f32.xlu0 %v274_v10 }
 0x166   : > { %v276_v11 = vpop.xlane.xlu0 %275 }
 0x167   : > { %v277_v12 = vmul.f32 0.03125, %v276_v11 }
 0x169   : > { %v278_v13 = vadd.f32 1e-12, %v277_v12 }
 0x16b   : > { %464 = vrsqrt.f32 %v278_v13 }
 0x178   : > { %v465_v14 = vpop.eup %464 }
 0x179   : > { %v280_v16 = vmul.f32 %v465_v14, %v272_v8 }
 0x17b   : > { %v287_v18 = vmul.f32 %v401_v15, %v280_v16 }
 0x17d   : > { %v294_v19 = vadd.f32 %v402_v17, %v287_v18 }
 0x17f   : > { %295 = vst.msk [vmem:[%s252_s15] sm:$0xff] %vm266_vm0, %v294_v19 }
 0x180   : > { %533 = shalt.err (!%p530_p3)
}
 0x181   : > { %s534_s27 = scalar_lea.hbm %s308_s28, 128  ;;  %s538_s30 = scalar_lea.hbm %s810_s5, 256 }
 0x182   : > { %p535_p12 = scmp.ne.s32.totalorder %s308_s28, %s534_s27  ;;  %p539_p4 = scmp.lt.s32.totalorder %s308_s28, %s810_s5 }
 0x183   : > { %p540_p6 = scmp.lt.s32.totalorder %s538_s30, %s534_s27 }
 0x184   : > { %p536_p5 = pnand %p535_p12, %p827_p11 }
 0x185   : > { %p541_p8 = por %p540_p6, %p539_p4 }
 0x186   : > { %p537_p7 = pneg %p536_p5 }
 0x188   : > { %p542_p9 = pnand %p541_p8, %p537_p7 }
 0x18a   : > { %545 = shalt.err (!%p542_p9)
}
 0x18b   : > { %413 = dma.vmem_to_hbm [thread:$0]  (%p827_p11), %s311_s17, 128, %s308_s28, %s297_s10  }
 0x18c PF: > { %s322_s16 = sand.u32 1, %s576_s18   ;;  %p828_p13 = scmp.ne.s32.totalorder %s816_s25, 0 }
 0x18d   : > { %p829_p10 = scmp.ge.s32.totalorder %s588_s21, 2  ;;  %s323_s15 = scalar_lea.sflag [#allocation4], %s322_s16 }
 0x18f   : > { %p424_p1 = pnand %p829_p10, %p828_p13 }
 0x191   : > { %p425_p2 = pneg %p424_p1 }
 0x193   : > { %571 = dma.done.wait (%p425_p2), %s323_s15, 128  }
 0x194   : > { %573 = vsyncadd (%p425_p2), %s323_s15, 4294967168  ;;  %p19_p0 = scmp.ge.s32.totalorder %s671_s29, 4   ;;  %s830_s18 = smov %s580_s19 }
 0x195   : > { %s831_s19 = smov %s584_s20  ;;  %s832_s20 = smov %s698_s12 }
 0x196   : > { %s833_s21 = smov %s671_s29  ;;  %21 = sbr.rel (!%p19_p0) target bundleno = 6 (0x6), region = 89 }
 0x19b   :  { %328 = vsyncpa [#allocation3], 1 }
 0x19c   :  { %330 = vsyncpa [#allocation3 + $0x1], 1 }
 0x19d   :  { %331 = vsyncpa [#allocation6], 1 }
 0x19e   :  { %332 = vsyncpa [#allocation4], 1 }
 0x19f   :  { %334 = vsyncpa [#allocation4 + $0x1], 1 }

</bundles_post_ra>
